<compile_context>
chip_gen: v7x
topology: tpu7x:2x2x1
jax: 0.10.0
libtpu: 0.0.40
codegen_flags: <defaults>
</compile_context>

<pallas_src>
import functools
import math

import jax
import jax.numpy as jnp
from jax import lax
from jax.experimental import pallas as pl
from jax.experimental.pallas import tpu as pltpu

EPS = 1e-5                 # BatchNorm eps (PyTorch default)
MAX_TILE_LANES = 512       # lane-tile target (bounds in-kernel live values)


# ---------------------------------------------------------------------------
# In-kernel helpers: 3x3 halo taps via lane rolls + iota boundary masks
# ---------------------------------------------------------------------------
def _make_masks(hh, ww, p):
    """Boundary-validity masks (1,p) for the 9 taps; None for the centre tap.

    Lane layout inside a tile: whole images, row-major (i*ww + j), then zero
    padding up to p.  Masks depend only on (i mod hh, j), so multiple images
    per tile and trailing padding are handled for free.
    """
    lane = lax.broadcasted_iota(jnp.int32, (1, p), 1)
    jj = lane % ww
    ii = (lane // ww) % hh
    masks = []
    for di in (-1, 0, 1):
        for dj in (-1, 0, 1):
            if di == 0 and dj == 0:
                masks.append(None)
                continue
            conds = []
            if di == -1:
                conds.append(ii >= 1)
            elif di == 1:
                conds.append(ii <= hh - 2)
            if dj == -1:
                conds.append(jj >= 1)
            elif dj == 1:
                conds.append(jj <= ww - 2)
            m = conds[0]
            for cnd in conds[1:]:
                m = jnp.logical_and(m, cnd)
            masks.append(m)
    return masks


def _shift_tap(x, di, dj, mask, ww, p, sgn):
    """tap[:, s] = x[:, s + di*ww + dj] (zero outside the image), via lane roll."""
    off = di * ww + dj
    if off % p == 0:
        y = x
    else:
        y = pltpu.roll(x, shift=(sgn * off) % p, axis=1)
    if mask is None:
        return y
    return jnp.where(mask, y, 0.0)


def _cmat(wm, x):
    """(Co,K) @ (K,P); MXU matmul, or VPU outer-product loop for tiny K."""
    k = wm.shape[1]
    if k >= 8:
        return jnp.dot(wm, x, precision=lax.Precision.HIGHEST,
                       preferred_element_type=jnp.float32)
    out = wm[:, 0:1] * x[0:1, :]
    for ci in range(1, k):
        out = out + wm[:, ci:ci + 1] * x[ci:ci + 1, :]
    return out


def _dw3x3(x, wtaps_ref, masks, ww, p, sgn):
    """Depthwise 3x3: sum_t wtaps[t] (C,1) * tap_t(x) (C,P)."""
    acc = None
    t = 0
    for di in (-1, 0, 1):
        for dj in (-1, 0, 1):
            tap = _shift_tap(x, di, dj, masks[t], ww, p, sgn)
            term = tap * wtaps_ref[t]
            acc = term if acc is None else acc + term
            t += 1
    return acc


def _conv3x3(x, wtaps_ref, masks, ww, p, sgn):
    """Dense 3x3: sum_t wtaps[t] (Co,C) @ tap_t(x) (C,P)."""
    acc = None
    t = 0
    for di in (-1, 0, 1):
        for dj in (-1, 0, 1):
            tap = _shift_tap(x, di, dj, masks[t], ww, p, sgn)
            term = _cmat(wtaps_ref[t], tap)
            acc = term if acc is None else acc + term
            t += 1
    return acc


def _leaky(x):
    return jnp.where(x >= 0.0, x, 0.01 * x)


# ---------------------------------------------------------------------------
# Fused block kernels
# ---------------------------------------------------------------------------
def _down_block_kernel(x_ref, wdw1, bdw1, wpw1, bpw1,
                       wdw2a, wdw2b, bdw2a, bdw2b,
                       wpw2a, wpw2b, bpw2,
                       w3a, w3b, w3c, b3, o_ref, *, hh, ww, sgn):
    """Whole DenseNet2D_down_block_mobile (BN folded, concats split)."""
    p = x_ref.shape[-1]
    masks = _make_masks(hh, ww, p)
    x = x_ref[...]                                               # (Cin, P)
    # conv11 (depthwise+BN+ReLU6) -> conv12 (pointwise+BN+ReLU6)
    h1 = jnp.clip(_dw3x3(x, wdw1, masks, ww, p, sgn) + bdw1[...], 0.0, 6.0)
    x12 = jnp.clip(_cmat(wpw1[...], h1) + bpw1[...], 0.0, 6.0)   # (Cin+Cout, P)
    # conv21 depthwise on cat(x, x12), split by part
    h2a = jnp.clip(_dw3x3(x, wdw2a, masks, ww, p, sgn) + bdw2a[...], 0.0, 6.0)
    h2b = jnp.clip(_dw3x3(x12, wdw2b, masks, ww, p, sgn) + bdw2b[...], 0.0, 6.0)
    # conv22 pointwise on cat(h2a, h2b)
    x22 = jnp.clip(_cmat(wpw2a[...], h2a) + _cmat(wpw2b[...], h2b)
                   + bpw2[...], 0.0, 6.0)                        # (Cout, P)
    # conv3 (dense 3x3 + bias) + BN, on cat(x, x12, x22), split by part
    out = (_conv3x3(x, w3a, masks, ww, p, sgn)
           + _conv3x3(x12, w3b, masks, ww, p, sgn)
           + _conv3x3(x22, w3c, masks, ww, p, sgn)
           + b3[...])
    o_ref[...] = out


def _up_block_kernel(*refs, hh, ww, sgn, final):
    """Whole DenseNet2D_up_block_concat (optionally + final 1x1 out conv)."""
    if final:
        (xu_ref, pv_ref, w11x, w11p, b11, w12, b12,
         w21x, w21p, w21y, b21, w22, b22, wout, bout, o_ref) = refs
    else:
        (xu_ref, pv_ref, w11x, w11p, b11, w12, b12,
         w21x, w21p, w21y, b21, w22, b22, o_ref) = refs
    p = xu_ref.shape[-1]
    masks = _make_masks(hh, ww, p)
    xu = xu_ref[...]                                             # upsampled x
    pv = pv_ref[...]                                             # skip features
    # conv11 (1x1 on cat(xu, prev)) -> conv12 (3x3) -> leaky
    t11 = _cmat(w11x[...], xu) + _cmat(w11p[...], pv) + b11[...]
    x1 = _leaky(_conv3x3(t11, w12, masks, ww, p, sgn) + b12[...])
    # conv21 (1x1 on cat(xu, prev, x1)) -> conv22 (3x3) -> leaky
    t21 = (_cmat(w21x[...], xu) + _cmat(w21p[...], pv)
           + _cmat(w21y[...], x1) + b21[...])
    out = _leaky(_conv3x3(t21, w22, masks, ww, p, sgn) + b22[...])
    if final:
        out = _cmat(wout[...], out) + bout[...]                  # out_conv1
    o_ref[...] = out


# ---------------------------------------------------------------------------
# pltpu.roll shift-convention probe (robustness against sign convention)
# ---------------------------------------------------------------------------
def _roll_probe_kernel(x_ref, o_ref):
    o_ref[...] = pltpu.roll(x_ref[...], shift=1, axis=1)


def _detect_roll_sign():
    x = jnp.arange(128, dtype=jnp.float32).reshape(1, 128)
    y = pl.pallas_call(
        _roll_probe_kernel,
        out_shape=jax.ShapeDtypeStruct((1, 128), jnp.float32))(x)
    # jnp.roll convention: out[0] == 127  ->  shift = -offset  -> sgn = -1
    return -1 if float(y[0, 0]) == 127.0 else 1


# ---------------------------------------------------------------------------
# Lane tiling (whole images per tile, padded to multiples of 128 lanes)
# ---------------------------------------------------------------------------
def _round_up(x, m):
    return ((x + m - 1) // m) * m


def _tile_cfg(n, hh, ww):
    pix = hh * ww
    g = 1
    for cand in range(1, n + 1):
        if n % cand == 0 and cand * pix <= MAX_TILE_LANES:
            g = cand
    if n // g == 1 and n > 1:
        # prefer >=2 grid steps (megacore) if the tile keeps >=128 real lanes
        for cand in range(g - 1, 0, -1):
            if n % cand == 0 and cand * pix >= 128:
                g = cand
                break
    p = _round_up(g * pix, 128)
    return g, p


def _to_tiles(x_cnhw, g, p):
    c, n, hh, ww = x_cnhw.shape
    grid_n = n // g
    rs = g * hh * ww
    x2 = x_cnhw.reshape(c, grid_n, rs)
    if p > rs:
        x2 = jnp.pad(x2, ((0, 0), (0, 0), (0, p - rs)))
    return x2.reshape(c, grid_n * p)


def _from_tiles(y, c, n, hh, ww, g, p):
    grid_n = n // g
    rs = g * hh * ww
    y = y.reshape(c, grid_n, p)[:, :, :rs]
    return y.reshape(c, n, hh, ww)


def _const_spec(a):
    nd = a.ndim
    return pl.BlockSpec(a.shape, lambda i, _nd=nd: (0,) * _nd)


def _run_block(kernel, acts, weights, cout, n, hh, ww):
    g, p = _tile_cfg(n, hh, ww)
    grid_n = n // g
    tiles = [_to_tiles(a, g, p) for a in acts]
    act_specs = [pl.BlockSpec((a.shape[0], p), lambda i: (0, i)) for a in acts]
    w_specs = [_const_spec(wa) for wa in weights]
    out = pl.pallas_call(
        kernel,
        out_shape=jax.ShapeDtypeStruct((cout, grid_n * p), jnp.float32),
        grid=(grid_n,),
        in_specs=act_specs + w_specs,
        out_specs=pl.BlockSpec((cout, p), lambda i: (0, i)),
        compiler_params=pltpu.CompilerParams(
            dimension_semantics=("parallel",)),
    )(*tiles, *weights)
    return _from_tiles(out, cout, n, hh, ww, g, p)


# ---------------------------------------------------------------------------
# XLA glue (activations carried as (C, N, H, W))
# ---------------------------------------------------------------------------
def _avg_pool2(x):
    c, n, hh, ww = x.shape
    return x.reshape(c, n, hh // 2, 2, ww // 2, 2).mean(axis=(3, 5))


def _upsample2(x):
    return jnp.repeat(jnp.repeat(x, 2, axis=2), 2, axis=3)


_DOWN_KEYS = ("wdw1", "bdw1", "wpw1", "bpw1", "wdw2a", "wdw2b", "bdw2a",
              "bdw2b", "wpw2a", "wpw2b", "bpw2", "w3a", "w3b", "w3c", "b3")
_UP_KEYS = ("w11x", "w11p", "b11", "w12", "b12", "w21x", "w21p", "w21y",
            "b21", "w22", "b22")


def _down_block(x, fp, pool, sgn):
    if pool:
        x = _avg_pool2(x)
    _, n, hh, ww = x.shape
    cout = fp["b3"].shape[0]
    kern = functools.partial(_down_block_kernel, hh=hh, ww=ww, sgn=sgn)
    weights = [fp[k] for k in _DOWN_KEYS]
    return _run_block(kern, [x], weights, cout, n, hh, ww)


def _up_block(prev, x, fp, sgn, final=None):
    xu = _upsample2(x)                      # 16-ch low-res -> full-res glue
    _, n, hh, ww = prev.shape
    weights = [fp[k] for k in _UP_KEYS]
    if final is not None:
        wout, bout = final
        weights += [wout, bout]
        cout = wout.shape[0]
    else:
        cout = fp["b11"].shape[0]
    kern = functools.partial(_up_block_kernel, hh=hh, ww=ww, sgn=sgn,
                             final=final is not None)
    return _run_block(kern, [xu, prev], weights, cout, n, hh, ww)


def dense_mobile_net_pallas(x_nchw, fp, *, roll_sgn):
    x = jnp.transpose(x_nchw.astype(jnp.float32), (1, 0, 2, 3))  # (C,N,H,W)
    x1 = _down_block(x, fp["down1"], pool=False, sgn=roll_sgn)
    x2 = _down_block(x1, fp["down2"], pool=True, sgn=roll_sgn)
    x3 = _down_block(x2, fp["down3"], pool=True, sgn=roll_sgn)
    x4 = _down_block(x3, fp["down4"], pool=True, sgn=roll_sgn)
    x5 = _down_block(x4, fp["down5"], pool=True, sgn=roll_sgn)
    x6 = _up_block(x4, x5, fp["up1"], sgn=roll_sgn)
    x7 = _up_block(x3, x6, fp["up2"], sgn=roll_sgn)
    x8 = _up_block(x2, x7, fp["up3"], sgn=roll_sgn)
    out = _up_block(x1, x8, fp["up4"], sgn=roll_sgn,
                    final=(fp["out_w"], fp["out_b"]))
    return jnp.transpose(out, (1, 0, 2, 3))                      # (N,C,H,W)


# ---------------------------------------------------------------------------
# Parameters (PyTorch layout) and BN folding into kernel-ready matrices
# ---------------------------------------------------------------------------
def _conv_w(key, cout, cin, k):
    std = math.sqrt(2.0 / (k * k * cout))      # matches _initialize_weights
    return std * jax.random.normal(key, (cout, cin, k, k), dtype=jnp.float32)


def _bias(key, c):
    return 0.05 * jax.random.normal(key, (c,), dtype=jnp.float32)


def _bn(key, c):
    k1, k2, k3, k4 = jax.random.split(key, 4)
    gamma = 1.0 + 0.2 * jax.random.normal(k1, (c,), dtype=jnp.float32)
    beta = 0.1 * jax.random.normal(k2, (c,), dtype=jnp.float32)
    mean = 0.1 * jax.random.normal(k3, (c,), dtype=jnp.float32)
    var = jax.random.uniform(k4, (c,), jnp.float32, 0.5, 1.5)
    return (gamma, beta, mean, var)


def _make_down(key, cin, cout):
    ks = jax.random.split(key, 11)
    c1 = 2 * cin + cout
    return dict(
        dw1_w=_conv_w(ks[0], cin, 1, 3), dw1_bn=_bn(ks[1], cin),
        pw1_w=_conv_w(ks[2], cin + cout, cin, 1), pw1_bn=_bn(ks[3], cin + cout),
        dw2_w=_conv_w(ks[4], c1, 1, 3), dw2_bn=_bn(ks[5], c1),
        pw2_w=_conv_w(ks[6], cout, c1, 1), pw2_bn=_bn(ks[7], cout),
        c3_w=_conv_w(ks[8], cout, 2 * cin + 2 * cout, 3), c3_b=_bias(ks[9], cout),
        bn3=_bn(ks[10], cout),
    )


def _make_up(key, skip_c, in_c, out_c):
    ks = jax.random.split(key, 8)
    return dict(
        c11_w=_conv_w(ks[0], out_c, skip_c + in_c, 1), c11_b=_bias(ks[1], out_c),
        c12_w=_conv_w(ks[2], out_c, out_c, 3), c12_b=_bias(ks[3], out_c),
        c21_w=_conv_w(ks[4], out_c, skip_c + in_c + out_c, 1),
        c21_b=_bias(ks[5], out_c),
        c22_w=_conv_w(ks[6], out_c, out_c, 3), c22_b=_bias(ks[7], out_c),
    )


def make_params(key, in_channels=1, out_channels=4, cs=16):
    ks = jax.random.split(key, 11)
    return dict(
        down1=_make_down(ks[0], in_channels, cs),
        down2=_make_down(ks[1], cs, cs),
        down3=_make_down(ks[2], cs, cs),
        down4=_make_down(ks[3], cs, cs),
        down5=_make_down(ks[4], cs, cs),
        up1=_make_up(ks[5], cs, cs, cs),
        up2=_make_up(ks[6], cs, cs, cs),
        up3=_make_up(ks[7], cs, cs, cs),
        up4=_make_up(ks[8], cs, cs, cs),
        out_w=_conv_w(ks[9], out_channels, cs, 1),
        out_b=_bias(ks[10], out_channels),
    )


def _bn_scale_shift(bn):
    g, b, m, v = bn
    s = g / jnp.sqrt(v + EPS)
    return s, b - m * s


def _taps_from_dw(w_dw, scale):
    """(C,1,3,3) depthwise weight * per-channel BN scale -> (9, C, 1)."""
    wc = w_dw[:, 0] * scale[:, None, None]
    return jnp.transpose(wc, (1, 2, 0)).reshape(9, -1, 1)


def _taps_from_full(w_conv, scale=None):
    """(Co,Ci,3,3) -> (9, Co, Ci), optional per-Co scaling."""
    if scale is not None:
        w_conv = w_conv * scale[:, None, None, None]
    co, ci = w_conv.shape[0], w_conv.shape[1]
    return jnp.transpose(w_conv, (2, 3, 0, 1)).reshape(9, co, ci)


def _fold_down(rp, cin, cout):
    s1, t1 = _bn_scale_shift(rp["dw1_bn"])
    s2, t2 = _bn_scale_shift(rp["pw1_bn"])
    s3, t3 = _bn_scale_shift(rp["dw2_bn"])
    s4, t4 = _bn_scale_shift(rp["pw2_bn"])
    s5, t5 = _bn_scale_shift(rp["bn3"])
    c12 = cin + cout
    wdw2 = _taps_from_dw(rp["dw2_w"], s3)                 # (9, cin+c12, 1)
    wpw2 = rp["pw2_w"][:, :, 0, 0] * s4[:, None]          # (cout, cin+c12)
    w3t = _taps_from_full(rp["c3_w"], s5)                 # (9, cout, 2cin+2cout)
    b3 = rp["c3_b"] * s5 + t5
    return dict(
        wdw1=_taps_from_dw(rp["dw1_w"], s1), bdw1=t1.reshape(cin, 1),
        wpw1=rp["pw1_w"][:, :, 0, 0] * s2[:, None], bpw1=t2.reshape(c12, 1),
        wdw2a=wdw2[:, :cin], wdw2b=wdw2[:, cin:],
        bdw2a=t3[:cin].reshape(cin, 1), bdw2b=t3[cin:].reshape(c12, 1),
        wpw2a=wpw2[:, :cin], wpw2b=wpw2[:, cin:],
        bpw2=t4.reshape(cout, 1),
        w3a=w3t[:, :, :cin], w3b=w3t[:, :, cin:cin + c12],
        w3c=w3t[:, :, cin + c12:],
        b3=b3.reshape(cout, 1),
    )


def _fold_up(rp, skip_c, in_c, out_c):
    w11 = rp["c11_w"][:, :, 0, 0]
    w21 = rp["c21_w"][:, :, 0, 0]
    return dict(
        w11x=w11[:, :in_c], w11p=w11[:, in_c:],
        b11=rp["c11_b"].reshape(out_c, 1),
        w12=_taps_from_full(rp["c12_w"]), b12=rp["c12_b"].reshape(out_c, 1),
        w21x=w21[:, :in_c], w21p=w21[:, in_c:in_c + skip_c],
        w21y=w21[:, in_c + skip_c:], b21=rp["c21_b"].reshape(out_c, 1),
        w22=_taps_from_full(rp["c22_w"]), b22=rp["c22_b"].reshape(out_c, 1),
    )


def fold_params(p, in_channels=1, cs=16):
    f = {}
    cin = in_channels
    for name in ("down1", "down2", "down3", "down4", "down5"):
        f[name] = _fold_down(p[name], cin, cs)
        cin = cs
    for name in ("up1", "up2", "up3", "up4"):
        f[name] = _fold_up(p[name], skip_c=cs, in_c=cs, out_c=cs)
    f["out_w"] = p["out_w"][:, :, 0, 0]
    f["out_b"] = p["out_b"].reshape(-1, 1)
    return f


# ---------------------------------------------------------------------------
# Pure-JAX reference (direct transcription of the PyTorch forward)
# ---------------------------------------------------------------------------
def _conv_ref(x, w, b=None, padding=0, groups=1):
    out = lax.conv_general_dilated(
        x, w, window_strides=(1, 1),
        padding=((padding, padding), (padding, padding)),
        dimension_numbers=("NCHW", "OIHW", "NCHW"),
        feature_group_count=groups,
        precision=lax.Precision.HIGHEST)
    if b is not None:
        out = out + b[None, :, None, None]
    return out


def _bn_ref(x, bn):
    g, b, m, v = (a[None, :, None, None] for a in bn)
    return g * (x - m) / jnp.sqrt(v + EPS) + b


def _relu6(x):
    return jnp.clip(x, 0.0, 6.0)


def _down_block_ref(x, rp, pool):
    if pool:
        n, c, h, w = x.shape
        x = x.reshape(n, c, h // 2, 2, w // 2, 2).mean(axis=(3, 5))
    t = _relu6(_bn_ref(_conv_ref(x, rp["dw1_w"], padding=1, groups=x.shape[1]),
                       rp["dw1_bn"]))
    x12 = _relu6(_bn_ref(_conv_ref(t, rp["pw1_w"]), rp["pw1_bn"]))
    x21 = jnp.concatenate([x, x12], axis=1)
    t = _relu6(_bn_ref(_conv_ref(x21, rp["dw2_w"], padding=1,
                                 groups=x21.shape[1]), rp["dw2_bn"]))
    x22 = _relu6(_bn_ref(_conv_ref(t, rp["pw2_w"]), rp["pw2_bn"]))
    x31 = jnp.concatenate([x21, x22], axis=1)
    return _bn_ref(_conv_ref(x31, rp["c3_w"], rp["c3_b"], padding=1), rp["bn3"])


def _up_block_ref(prev, x, rp):
    xu = jnp.repeat(jnp.repeat(x, 2, axis=2), 2, axis=3)
    xc = jnp.concatenate([xu, prev], axis=1)
    x1 = _leaky(_conv_ref(_conv_ref(xc, rp["c11_w"], rp["c11_b"]),
                          rp["c12_w"], rp["c12_b"], padding=1))
    x21 = jnp.concatenate([xc, x1], axis=1)
    return _leaky(_conv_ref(_conv_ref(x21, rp["c21_w"], rp["c21_b"]),
                            rp["c22_w"], rp["c22_b"], padding=1))


def dense_mobile_net_ref(x, p):
    x = x.astype(jnp.float32)
    x1 = _down_block_ref(x, p["down1"], False)
    x2 = _down_block_ref(x1, p["down2"], True)
    x3 = _down_block_ref(x2, p["down3"], True)
    x4 = _down_block_ref(x3, p["down4"], True)
    x5 = _down_block_ref(x4, p["down5"], True)
    x6 = _up_block_ref(x4, x5, p["up1"])
    x7 = _up_block_ref(x3, x6, p["up2"])
    x8 = _up_block_ref(x2, x7, p["up3"])
    x9 = _up_block_ref(x1, x8, p["up4"])
    return _conv_ref(x9, p["out_w"], p["out_b"])


if __name__ == "__main__":
    root = jax.random.PRNGKey(0)
    kx, kp = jax.random.split(root)
    n, cin, h, w = 2, 1, 16, 16          # in_channels=1 (module default)
    x = jax.random.normal(kx, (n, cin, h, w), dtype=jnp.float32)

    params = make_params(kp, in_channels=cin, out_channels=4, cs=16)
    folded = fold_params(params, in_channels=cin, cs=16)

    roll_sgn = _detect_roll_sign()       # eager probe (outside jit)
    fwd = jax.jit(functools.partial(dense_mobile_net_pallas, roll_sgn=roll_sgn))
    out = jax.block_until_ready(fwd(x, folded))

    ref = dense_mobile_net_ref(x, params)
    assert out.shape == (n, 4, h, w), out.shape
    assert ref.shape == out.shape
    assert bool(jnp.all(jnp.isfinite(out)))
    err = float(jnp.max(jnp.abs(out - ref)))
    assert bool(jnp.allclose(out, ref, atol=1e-2, rtol=1e-2)), \
        f"max abs err {err}"
    print("KERNEL_OK")
</pallas_src>

<mosaic_0001>
module attributes {stable_mosaic.version = 11 : i64} {
  func.func @_roll_probe_kernel(%arg0: memref<1x128xf32, #tpu.memory_space<vmem>>, %arg1: memref<1x128xf32, #tpu.memory_space<vmem>>) attributes {dimension_semantics = [], scalar_prefetch = 0 : i64, scratch_operands = 0 : i64, tpu.core_type = #tpu.core_type<tc>} {
    %c0 = arith.constant 0 : index
    %c0_0 = arith.constant 0 : index
    %0 = vector.load %arg0[%c0, %c0_0] : memref<1x128xf32, #tpu.memory_space<vmem>>, vector<1x128xf32>
    %c1_i32 = arith.constant 1 : i32
    %1 = tpu.dynamic_rotate %0 by %c1_i32 dim 1 : vector<1x128xf32>, i32 -> vector<1x128xf32>
    %c0_1 = arith.constant 0 : index
    %c0_2 = arith.constant 0 : index
    %2 = vector.load %arg1[%c0_1, %c0_2] : memref<1x128xf32, #tpu.memory_space<vmem>>, vector<1x128xf32>
    tpu.vector_store %arg1[%c0_1, %c0_2], %1 {strides = array<i32>} : memref<1x128xf32, #tpu.memory_space<vmem>>, vector<1x128xf32>,
    return
  }
}

</mosaic_0001>

<bundles_post_ra>
// kernel: tpu_custom_call.1
= control target key start
LH: loop header
LB: loop body
LE: loop exit
PB: predicated region body
PF: predicated region fallthrough
CT: control target
= control target key end

     0   :  { %6 = vsyncpa [#allocation3], 0  ;;  %s128_s0 = inlined_call_operand.hbm [shape: f32[1,128], index: 0, kind: input, shape index: {}]   ;;  %s129_s1 = inlined_call_operand.hbm [shape: f32[1,128], index: 1, kind: output, shape index: {}]  }
   0x1   :  { %7 = vsyncpa [#allocation4], 0  ;;  %s91_s6 = smov [#allocation2]   ;;  %s43_s10 = scalar_lea.hbm %s128_s0, 16 }
   0x2   :  { %s14_s7 = sshll.u32 %s91_s6, 4  ;;  %p44_p0 = scmp.ne.s32.totalorder %s128_s0, %s43_s10  ;;  %s15_s7 = int_to_ptr.vmem [resolvable:$true] %s14_s7 }
   0x3   :  { %p47_p1 = scmp.lt.u32.totalorder %s43_s10, %s128_s0 }
   0x5   :  { %p49_p2 = pnand %p47_p1, %p44_p0 }
   0x7   :  { %52 = shalt.err (!%p49_p2)
}
   0x8   :  { %s53_s15 = scalar_lea.vmem %s15_s7, 16  ;;  %s57_s16 = scalar_lea.vmem %s15_s7, 32 }
   0x9   :  { %p54_p3 = scmp.ne.s32.totalorder %s15_s7, %s53_s15  ;;  %p58_p4 = scmp.lt.s32.totalorder %s15_s7, %s15_s7 }
   0xa   :  { %p59_p5 = scmp.lt.s32.totalorder %s57_s16, %s53_s15 }
   0xc   :  { %p60_p6 = por %p59_p5, %p58_p4 }
   0xe   :  { %p61_p7 = pnand %p60_p6, %p54_p3 }
  0x10   :  { %64 = shalt.err (!%p61_p7)
}
  0x11   :  { %17 = dma.hbm_to_vmem [thread:$0]  %s128_s0, 16, %s15_s7, [#allocation3]  }
  0x12   :  { %87 = dma.done.wait [#allocation3], 16  }
  0x13   :  { %88 = vsyncadd [#allocation3], 4294967280  ;;  %v21_v0 = vld [vmem:[#allocation2] sm:$0x1]  ;;  %s92_s19 = smov 1   ;;  %s93_s20 = smov [#allocation5]  }
  0x14   :  { %22 = vrot.lane.b32.xlu0 %v21_v0, %s92_s19  ;;  %s31_s21 = sshll.u32 %s93_s20, 4  ;;  %s32_s21 = int_to_ptr.vmem [resolvable:$true] %s31_s21 }
  0x15   :  { %s65_s22 = scalar_lea.vmem %s32_s21, 16  ;;  %s69_s23 = scalar_lea.vmem %s32_s21, 32 }
  0x16   :  { %p66_p8 = scmp.ne.s32.totalorder %s32_s21, %s65_s22  ;;  %p70_p9 = scmp.lt.s32.totalorder %s32_s21, %s32_s21 }
  0x17   :  { %p71_p10 = scmp.lt.s32.totalorder %s69_s23, %s65_s22 }
  0x19   :  { %p72_p11 = por %p71_p10, %p70_p9 }
  0x1b   :  { %p73_p12 = pnand %p72_p11, %p66_p8 }
  0x86   :  { %v23_v1 = vpop.permute.xlu0 %22 }
  0x87   :  { %24 = vst [vmem:[#allocation5] sm:$0x1] %v23_v1 }
  0x88   :  { %76 = shalt.err (!%p73_p12)
}
  0x89   :  { %s77_s25 = scalar_lea.hbm %s129_s1, 16 }
  0x8a   :  { %p78_p13 = scmp.ne.s32.totalorder %s129_s1, %s77_s25  ;;  %p81_p0 = scmp.lt.u32.totalorder %s77_s25, %s129_s1 }
  0x8c   :  { %p83_p1 = pnand %p81_p0, %p78_p13 }
  0x8e   :  { %86 = shalt.err (!%p83_p1)
}
  0x8f   :  { %34 = dma.vmem_to_hbm [thread:$0]  %s32_s21, 16, %s129_s1, [#allocation4]  }
  0x90   :  { %89 = dma.done.wait [#allocation4], 16  }
  0x91   :  { %90 = vsyncadd [#allocation4], 4294967280 }
  0x92   :  { %38 = vsyncpa [#allocation3], 1 }
  0x93   :  { %39 = vsyncpa [#allocation4], 1 }

</bundles_post_ra>
